<compile_context>
chip_gen: v7x
topology: tpu7x:2x2x1
jax: 0.10.0
libtpu: 0.0.40
codegen_flags: <defaults>
</compile_context>

<pallas_src>
import jax
import jax.numpy as jnp
import numpy as np
from jax.experimental import pallas as pl
from jax.experimental.pallas import tpu as pltpu


def _round_up(a, b):
    return (a + b - 1) // b * b


def _ensemble_kernel(x_ref, w_ref, b_ref, ew_ref, o_ref):
    """One (batch, pixel-tile) grid step of the ensemble forward pass.

    x_ref : (1, 1, TP)  VMEM  input image values (single input channel), f32
    w_ref : (M, C, 1)   VMEM  per-model 1x1-conv weights laid out as columns
    b_ref : (M, C, 1)   VMEM  per-model biases laid out as columns
    ew_ref: (M,)        SMEM  ensemble weights (weight_list)
    o_ref : (1, C, TP)  VMEM  final ensemble probabilities
    """
    x = x_ref[0]                        # (1, TP)
    W = w_ref[...]                      # (M, C, 1)
    B = b_ref[...]                      # (M, C, 1)
    M, C, _ = W.shape
    TP = x.shape[-1]

    # Hoist the sublane broadcast of x out of the per-model loop.
    xb = jnp.broadcast_to(x, (C, TP))   # (C, TP)

    acc = jnp.zeros((C, TP), jnp.float32)
    # M is tiny (2): static Python unroll.
    for m in range(M):
        # per-pixel linear model: logits[c, p] = W[m, c] * x[p] + b[m, c]
        logits = W[m] * xb + B[m]                              # (C,1)*(C,TP)+(C,1)
        # per-model softmax over classes (numerically stable like F.softmax)
        logits = logits - jnp.max(logits, axis=0, keepdims=True)
        e = jnp.exp(logits)
        inv = pl.reciprocal(jnp.sum(e, axis=0, keepdims=True), approx=False)
        acc = acc + ew_ref[m] * (e * inv)                      # SMEM scalar weight

    # final softmax over classes; acc is a convex combination of probabilities
    # (bounded in [0, 1]) so no max-subtraction is needed.
    e = jnp.exp(acc)
    inv = pl.reciprocal(jnp.sum(e, axis=0, keepdims=True), approx=False)
    o_ref[0] = e * inv


def de_framework_linear_forward(img, valid_mask, Wm, Bm, weight_list,
                                num_classes=4, tile_pix=8192):
    """Replicates DE_framework_linear.weighted_avg.

    img        : (B, H, W) float
    valid_mask : (B,) bool
    Wm, Bm     : (M, num_classes) per-model 1x1-conv params (input channel = 1)
    returns    : (N_valid, num_classes, H, W) float32
    """
    # glue: boolean batch selection (eager, like torch img[valid_mask]; not jit-traceable)
    x = img[np.asarray(valid_mask)]                 # (Nv, H, W)
    Nv, H, W = x.shape
    HW = H * W
    M = Wm.shape[0]

    # lane-dense tile: multiple of 128, clamped to the (128-padded) image size
    tile = min(_round_up(tile_pix, 128), _round_up(HW, 128))
    HW_pad = _round_up(HW, tile)

    x_flat = jnp.reshape(x, (Nv, 1, HW)).astype(jnp.float32)
    if HW_pad != HW:
        x_flat = jnp.pad(x_flat, ((0, 0), (0, 0), (0, HW_pad - HW)))

    # parameters as (M, C, 1) columns: class axis already on sublanes
    Wcol = Wm.astype(jnp.float32).reshape(M, num_classes, 1)
    Bcol = Bm.astype(jnp.float32).reshape(M, num_classes, 1)
    ens_w = jnp.asarray(weight_list, jnp.float32).reshape(M)

    out = pl.pallas_call(
        _ensemble_kernel,
        out_shape=jax.ShapeDtypeStruct((Nv, num_classes, HW_pad), jnp.float32),
        grid_spec=pltpu.PrefetchScalarGridSpec(
            num_scalar_prefetch=0,
            grid=(Nv, HW_pad // tile),
            in_specs=[
                pl.BlockSpec((1, 1, tile), lambda b, i: (b, 0, i)),        # x tile
                pl.BlockSpec((M, num_classes, 1), lambda b, i: (0, 0, 0)), # weights
                pl.BlockSpec((M, num_classes, 1), lambda b, i: (0, 0, 0)), # biases
                pl.BlockSpec(memory_space=pltpu.MemorySpace.SMEM),         # ensemble weights
            ],
            out_specs=pl.BlockSpec((1, num_classes, tile), lambda b, i: (b, 0, i)),
        ),
        compiler_params=pltpu.CompilerParams(
            dimension_semantics=("parallel", "parallel")),
    )(x_flat, Wcol, Bcol, ens_w)

    if HW_pad != HW:
        out = out[:, :, :HW]
    # NCHW already class-major per image: plain reshape, no transpose needed.
    return out.reshape(Nv, num_classes, H, W)


def _reference(img, valid_mask, Wm, Bm, weight_list, num_classes=4):
    """Pure-JAX reference matching the PyTorch forward semantics."""
    x = img[np.asarray(valid_mask)][:, None, :, :]                 # (Nv,1,H,W)
    final = jnp.zeros((x.shape[0], num_classes, x.shape[2], x.shape[3]),
                      jnp.float32)
    for m, w in enumerate(weight_list):
        logits = Wm[m][None, :, None, None] * x + Bm[m][None, :, None, None]
        probs = jax.nn.softmax(logits, axis=1)
        final = final + w * probs
    return jax.nn.softmax(final, axis=1)


if __name__ == "__main__":
    key = jax.random.PRNGKey(0)
    k_img, k_w, k_b = jax.random.split(key, 3)

    B, H, W = 4, 16, 16
    num_classes = 4
    M = 2                                   # two ensemble members (UNet / DeepLab surrogates)
    weight_list = [0.6, 0.4]

    img = jax.random.normal(k_img, (B, H, W), jnp.float32)
    valid_mask = np.array([True, False, True, False])   # selects 2 batch entries

    # deterministic surrogate model parameters (1x1 conv: 1 -> num_classes)
    Wm = jax.random.normal(k_w, (M, num_classes), jnp.float32)
    Bm = 0.1 * jax.random.normal(k_b, (M, num_classes), jnp.float32)

    out = de_framework_linear_forward(img, valid_mask, Wm, Bm, weight_list,
                                      num_classes=num_classes)
    out = jax.block_until_ready(out)

    ref = _reference(img, valid_mask, Wm, Bm, weight_list, num_classes)
    assert out.shape == (int(valid_mask.sum()), num_classes, H, W), out.shape
    np.testing.assert_allclose(np.asarray(out), np.asarray(ref),
                               rtol=1e-5, atol=1e-5)
    print("KERNEL_OK")
</pallas_src>

<mosaic_0001>
module attributes {stable_mosaic.version = 11 : i64} {
  func.func @_ensemble_kernel(%arg0: i32, %arg1: i32, %arg2: memref<1x1x256xf32, #tpu.memory_space<vmem>>, %arg3: memref<2x4x1xf32, #tpu.memory_space<vmem>>, %arg4: memref<2x4x1xf32, #tpu.memory_space<vmem>>, %arg5: memref<2xf32, #tpu.memory_space<smem>>, %arg6: memref<1x4x256xf32, #tpu.memory_space<vmem>>) attributes {dimension_semantics = [#tpu.dimension_semantics<parallel>, #tpu.dimension_semantics<parallel>], iteration_bounds = array<i64: 2, 1>, scalar_prefetch = 0 : i64, scratch_operands = 0 : i64, tpu.core_type = #tpu.core_type<tc>, window_params = [{transform_indices = @transform_0, window_bounds = array<i64: 1, 1, 256>}, {pipeline_mode = #tpu.pipeline_mode<synchronous>, transform_indices = @transform_1, window_bounds = array<i64: 2, 4, 1>}, {pipeline_mode = #tpu.pipeline_mode<synchronous>, transform_indices = @transform_2, window_bounds = array<i64: 2, 4, 1>}, {transform_indices = @transform_3, window_bounds = array<i64: 2>}, {transform_indices = @transform_4, window_bounds = array<i64: 1, 4, 256>}]} {
    %c0 = arith.constant 0 : index
    %c0_0 = arith.constant 0 : index
    %c0_1 = arith.constant 0 : index
    %0 = vector.load %arg2[%c0, %c0_0, %c0_1] : memref<1x1x256xf32, #tpu.memory_space<vmem>>, vector<1x1x256xf32>
    %1 = vector.shape_cast %0 : vector<1x1x256xf32> to vector<1x256xf32>
    %c0_2 = arith.constant 0 : index
    %c0_3 = arith.constant 0 : index
    %c0_4 = arith.constant 0 : index
    %2 = vector.load %arg3[%c0_2, %c0_3, %c0_4] : memref<2x4x1xf32, #tpu.memory_space<vmem>>, vector<2x4x1xf32>
    %c0_5 = arith.constant 0 : index
    %c0_6 = arith.constant 0 : index
    %c0_7 = arith.constant 0 : index
    %3 = vector.load %arg4[%c0_5, %c0_6, %c0_7] : memref<2x4x1xf32, #tpu.memory_space<vmem>>, vector<2x4x1xf32>
    %4 = vector.shape_cast %1 : vector<1x256xf32> to vector<1x256xf32>
    %5 = vector.broadcast %4 : vector<1x256xf32> to vector<4x256xf32>
    %cst = arith.constant 0.000000e+00 : f32
    %6 = vector.broadcast %cst : f32 to vector<4x256xf32>
    %7 = vector.extract_strided_slice %2 {offsets = [0, 0, 0], sizes = [1, 4, 1], strides = [1, 1, 1]} : vector<2x4x1xf32> to vector<1x4x1xf32>
    %8 = vector.shape_cast %7 : vector<1x4x1xf32> to vector<4x1xf32>
    %9 = vector.broadcast %8 : vector<4x1xf32> to vector<4x256xf32>
    %10 = arith.mulf %9, %5 : vector<4x256xf32>
    %11 = vector.extract_strided_slice %3 {offsets = [0, 0, 0], sizes = [1, 4, 1], strides = [1, 1, 1]} : vector<2x4x1xf32> to vector<1x4x1xf32>
    %12 = vector.shape_cast %11 : vector<1x4x1xf32> to vector<4x1xf32>
    %13 = vector.broadcast %12 : vector<4x1xf32> to vector<4x256xf32>
    %14 = arith.addf %10, %13 : vector<4x256xf32>
    %cst_8 = arith.constant dense<0xFF800000> : vector<256xf32>
    %15 = vector.multi_reduction <maximumf>, %14, %cst_8 [0] : vector<4x256xf32> to vector<256xf32>
    %16 = vector.shape_cast %15 : vector<256xf32> to vector<1x256xf32>
    %17 = vector.broadcast %16 : vector<1x256xf32> to vector<4x256xf32>
    %18 = arith.subf %14, %17 : vector<4x256xf32>
    %19 = math.exp %18 : vector<4x256xf32>
    %cst_9 = arith.constant dense<0.000000e+00> : vector<256xf32>
    %20 = vector.multi_reduction <add>, %19, %cst_9 [0] : vector<4x256xf32> to vector<256xf32>
    %21 = vector.shape_cast %20 : vector<256xf32> to vector<1x256xf32>
    %22 = tpu.reciprocal %21 : vector<1x256xf32> -> vector<1x256xf32>
    %c0_10 = arith.constant 0 : index
    %23 = memref.load %arg5[%c0_10] : memref<2xf32, #tpu.memory_space<smem>>
    %24 = vector.broadcast %22 : vector<1x256xf32> to vector<4x256xf32>
    %25 = arith.mulf %19, %24 : vector<4x256xf32>
    %26 = vector.broadcast %23 : f32 to vector<4x256xf32>
    %27 = arith.mulf %26, %25 : vector<4x256xf32>
    %28 = arith.addf %6, %27 : vector<4x256xf32>
    %29 = vector.extract_strided_slice %2 {offsets = [1, 0, 0], sizes = [1, 4, 1], strides = [1, 1, 1]} : vector<2x4x1xf32> to vector<1x4x1xf32>
    %30 = vector.shape_cast %29 : vector<1x4x1xf32> to vector<4x1xf32>
    %31 = vector.broadcast %30 : vector<4x1xf32> to vector<4x256xf32>
    %32 = arith.mulf %31, %5 : vector<4x256xf32>
    %33 = vector.extract_strided_slice %3 {offsets = [1, 0, 0], sizes = [1, 4, 1], strides = [1, 1, 1]} : vector<2x4x1xf32> to vector<1x4x1xf32>
    %34 = vector.shape_cast %33 : vector<1x4x1xf32> to vector<4x1xf32>
    %35 = vector.broadcast %34 : vector<4x1xf32> to vector<4x256xf32>
    %36 = arith.addf %32, %35 : vector<4x256xf32>
    %cst_11 = arith.constant dense<0xFF800000> : vector<256xf32>
    %37 = vector.multi_reduction <maximumf>, %36, %cst_11 [0] : vector<4x256xf32> to vector<256xf32>
    %38 = vector.shape_cast %37 : vector<256xf32> to vector<1x256xf32>
    %39 = vector.broadcast %38 : vector<1x256xf32> to vector<4x256xf32>
    %40 = arith.subf %36, %39 : vector<4x256xf32>
    %41 = math.exp %40 : vector<4x256xf32>
    %cst_12 = arith.constant dense<0.000000e+00> : vector<256xf32>
    %42 = vector.multi_reduction <add>, %41, %cst_12 [0] : vector<4x256xf32> to vector<256xf32>
    %43 = vector.shape_cast %42 : vector<256xf32> to vector<1x256xf32>
    %44 = tpu.reciprocal %43 : vector<1x256xf32> -> vector<1x256xf32>
    %c1 = arith.constant 1 : index
    %45 = memref.load %arg5[%c1] : memref<2xf32, #tpu.memory_space<smem>>
    %46 = vector.broadcast %44 : vector<1x256xf32> to vector<4x256xf32>
    %47 = arith.mulf %41, %46 : vector<4x256xf32>
    %48 = vector.broadcast %45 : f32 to vector<4x256xf32>
    %49 = arith.mulf %48, %47 : vector<4x256xf32>
    %50 = arith.addf %28, %49 : vector<4x256xf32>
    %51 = math.exp %50 : vector<4x256xf32>
    %cst_13 = arith.constant dense<0.000000e+00> : vector<256xf32>
    %52 = vector.multi_reduction <add>, %51, %cst_13 [0] : vector<4x256xf32> to vector<256xf32>
    %53 = vector.shape_cast %52 : vector<256xf32> to vector<1x256xf32>
    %54 = tpu.reciprocal %53 : vector<1x256xf32> -> vector<1x256xf32>
    %55 = vector.broadcast %54 : vector<1x256xf32> to vector<4x256xf32>
    %56 = arith.mulf %51, %55 : vector<4x256xf32>
    %c0_14 = arith.constant 0 : index
    %c0_15 = arith.constant 0 : index
    %c0_16 = arith.constant 0 : index
    %57 = vector.load %arg6[%c0_14, %c0_15, %c0_16] : memref<1x4x256xf32, #tpu.memory_space<vmem>>, vector<1x4x256xf32>
    %58 = vector.shape_cast %57 : vector<1x4x256xf32> to vector<4x256xf32>
    %59 = vector.shape_cast %56 : vector<4x256xf32> to vector<1x4x256xf32>
    tpu.vector_store %arg6[%c0_14, %c0_15, %c0_16], %59 {strides = array<i32>} : memref<1x4x256xf32, #tpu.memory_space<vmem>>, vector<1x4x256xf32>,
    return
  }
  func.func @transform_0(%arg0: i32, %arg1: i32) -> (i32, i32, i32) {
    %c0_i32 = arith.constant 0 : i32
    %c0_i32_0 = arith.constant 0 : i32
    return %arg0, %c0_i32, %arg1 : i32, i32, i32
  }
  func.func @transform_1(%arg0: i32, %arg1: i32) -> (i32, i32, i32) {
    %c0_i32 = arith.constant 0 : i32
    %c0_i32_0 = arith.constant 0 : i32
    %c0_i32_1 = arith.constant 0 : i32
    %c0_i32_2 = arith.constant 0 : i32
    return %c0_i32, %c0_i32_0, %c0_i32_1 : i32, i32, i32
  }
  func.func @transform_2(%arg0: i32, %arg1: i32) -> (i32, i32, i32) {
    %c0_i32 = arith.constant 0 : i32
    %c0_i32_0 = arith.constant 0 : i32
    %c0_i32_1 = arith.constant 0 : i32
    %c0_i32_2 = arith.constant 0 : i32
    return %c0_i32, %c0_i32_0, %c0_i32_1 : i32, i32, i32
  }
  func.func @transform_3(%arg0: i32, %arg1: i32) -> i32 {
    %c0_i32 = arith.constant 0 : i32
    %c0_i32_0 = arith.constant 0 : i32
    return %c0_i32 : i32
  }
  func.func @transform_4(%arg0: i32, %arg1: i32) -> (i32, i32, i32) {
    %c0_i32 = arith.constant 0 : i32
    %c0_i32_0 = arith.constant 0 : i32
    return %arg0, %c0_i32, %arg1 : i32, i32, i32
  }
}

</mosaic_0001>

<bundles_post_ra>
// kernel: tpu_custom_call.1
= control target key start
LH: loop header
LB: loop body
LE: loop exit
PB: predicated region body
PF: predicated region fallthrough
CT: control target
= control target key end

     0   :  { %9 = vsyncpa [#allocation4], 0  ;;  %s891_s0 = inlined_call_operand.vmem [shape: f32[2,1,256], index: 0, kind: input, shape index: {}]   ;;  %s892_s1 = inlined_call_operand.vmem [shape: f32[2,4,1], index: 1, kind: input, shape index: {}]   ;;  %s893_s2 = inlined_call_operand.vmem [shape: f32[2,4,1], index: 2, kind: input, shape index: {}]   ;;  %s894_s3 = inlined_call_operand.vmem [shape: f32[2], index: 3, kind: input, shape index: {}]   ;;  %s895_s4 = inlined_call_operand.hbm [shape: f32[2,4,256], index: 4, kind: output, shape index: {}]  }
   0x1   :  { %10 = vsyncpa [#allocation3], 0 }
   0x2   :  { %12 = vsyncpa [#allocation3 + $0x1], 0  ;;  %s736_s15 = smov 0   ;;  %s738_s16 = smov 0  }
   0x3   :  { %s740_s17 = smov 0   ;;  %s742_s18 = smov 0  }
   0x4   :  { %s744_s19 = smov 0   ;;  %s746_s20 = smov 0  }
   0x5 LB: > { %s500_s21 = sadd.s32 4294967295, %s706_s20   ;;  %s501_s22 = sadd.s32 4294967294, %s706_s20   ;;  %s706_s20 = sphi %s746_s20, %s18_s20   ;;  %s702_s19 = sphi %s744_s19, %s904_s19   ;;  %s698_s18 = sphi %s742_s18, %s903_s18   ;;  %s694_s17 = sphi %s740_s17, %s902_s17   ;;  %s690_s16 = sphi %s738_s16, %s901_s16   ;;  %s686_s15 = sphi %s736_s15, %s900_s15  }
   0x6   : > { %s30_s23 = sadd.s32 1, %s702_s19  ;;  %s130_s24 = sadd.s32 1, %s694_s17 }
   0x7   : > { %p32_p0 = scmp.ge.s32.totalorder %s30_s23, 2  ;;  %p140_p1 = scmp.ne.s32.totalorder %s694_s17, %s690_s16 }
   0x8   : > { %p141_p2 = scmp.eq.s32.totalorder %s500_s21, 1  ;;  %p146_p3 = scmp.ne.s32.totalorder %s690_s16, %s686_s15 }
   0x9   : > { %s906_s23 = smov (%p32_p0, %s30_s23), 0  ;;  %p147_p5 = scmp.eq.s32.totalorder %s501_s22, 1 }
   0xa   : > { %p776_p4 = por %p141_p2, %p140_p1  ;;  %s125_s26 = ssub.s32 %s702_s19, %s906_s23 }
   0xb   : > { %p502_p6 = scmp.ge.s32.totalorder %s706_s20, 1  ;;  %p128_p7 = scmp.eq.s32.totalorder %s125_s26, 0 }
   0xc   : > { %p783_p8 = por %p147_p5, %p146_p3  ;;  %p154_p9 = scmp.lt.s32.totalorder %s706_s20, 3 }
   0xd   : > { %s789_s28 = scalar_select %p128_p7, %s694_s17, %s130_s24  }
   0xe   : > { %p791_p10 = pnand %p502_p6, %p154_p9  ;;  %p795_p11 = scmp.eq.s32.totalorder %s500_s21, 0 }
   0xf   : > { %s173_s7 = sshll.u32 %s894_s3, 4  ;;  %s174_s7 = int_to_ptr.vmem [resolvable:$true] %s173_s7 }
  0x10   : > { %p522_p12 = pneg %p791_p10  ;;  %s609_s8 = scalar_lea.vmem %s174_s7, 16 }
  0x11   : > { %p610_p0 = scmp.ne.s32.totalorder %s174_s7, %s609_s8  ;;  %p617_p5 = scmp.lt.s32.totalorder %s174_s7, %s174_s7 }
  0x12   : > { %p523_p13 = pnand %p795_p11, %p522_p12  ;;  %p618_p6 = scmp.lt.s32.totalorder %s609_s8, %s609_s8 }
  0x14   : > { %p611_p1 = pneg %p523_p13  ;;  %p619_p7 = por %p618_p6, %p617_p5 }
  0x16   : > { %p612_p2 = pnand %p611_p1, %p610_p0 }
  0x18   : > { %p613_p3 = pneg %p612_p2 }
  0x1a   : > { %p620_p9 = pnand %p619_p7, %p613_p3 }
  0x1c   : > { %623 = shalt.err (!%p620_p9)
}
  0x1d   : > { %s708_s9 = smov [#allocation2]   ;;  %198 = sbr.rel (%p791_p10) target bundleno = 291 (0x123), region = 36 }
  0x1e   : > { %525 = dma.vmem_to_smem (!%p523_p13), %s174_s7, 16, %s708_s9, [#allocation4]  }
  0x24   : > { %677 = dma.done.wait (%p795_p11), [#allocation4], 16  }
  0x25   : > { %679 = vsyncadd (%p795_p11), [#allocation4], 4294967280 }
  0x26   : > { %204 = sfence }
  0x27   : > { %v241_v0 = vld [vmem:[%s893_s2] sm:$0xf]  ;;  %v709_v2 = vmov 0   ;;  %v242_v3 = vld [vmem:[%s893_s2 + $0x4] sm:$0xf]  ;;  %p229_p10 = scmp.lt.s32.totalorder %s698_s18, 1  ;;  %v244_v5 = vlaneseq }
  0x28   : > { %v239_v1 = vld [vmem:[%s892_s1] sm:$0xf]  ;;  %584 = vset.pattern.permute.xlu1 %v709_v2  ;;  %583 = vset.pattern.permute.xlu0 %v709_v2  ;;  %v240_v4 = vld [vmem:[%s892_s1 + $0x4] sm:$0xf]  ;;  %vm268_vm0 = vcmask 1043456   ;;  %s305_s7 = sld [smem:[#allocation2]] }
  0x29   : > { %263 = vperm.xlu1 %584, %v241_v0   ;;  %256 = vperm.xlu0 %583, %v239_v1   ;;  %s230_s26 = scalar_select %p229_p10, %s698_s18, 1  ;;  %v245_v6 = vshrl.u32 %v244_v5, 7 }
  0x2a   : > { %s509_s8 = sld [smem:[#allocation2 + $0x1]]  ;;  %s225_s9 = sand.u32 1, %s690_s16  }
  0x2b   : > { %s508_s29 = sshll.u32 %s230_s26, 1  ;;  %v246_v7 = vsub.s32 0, %v245_v6  ;;  %v250_v8 = vsub.s32 1, %v245_v6  ;;  %s507_s10 = sshll.u32 %s225_s9, 3 }
  0x2c   : > { %s235_s6 = scalar_lea.vmem %s891_s0, %s508_s29  ;;  %s515_s11 = sshll.u32 %s698_s18, 7 }
  0x2d   : > { %322 = vperm.xlu1 %584, %v242_v3   ;;  %315 = vperm.xlu0 %583, %v240_v4   ;;  %v238_v9 = vld [vmem:[%s235_s6] sm:$0x3]  ;;  %s227_s12 = scalar_lea.vmem [#allocation5], %s507_s10  ;;  %s844_s22 = scalar_lea.hbm %s895_s4, %s515_s11 }
  0x2e   : > { %v247_v10 = vrot.slane %v238_v9, %v246_v7  ;;  %v251_v11 = vrot.slane %v238_v9, %v250_v8  ;;  %s415_s13 = sshll.u32 %s227_s12, 4  ;;  %s399_s24 = scalar_lea.sflag [#allocation3], %s225_s9  ;;  %s846_s13 = int_to_ptr.vmem [resolvable:$true] %s415_s13 }
  0x2f   : > { %s624_s26 = scalar_lea.vmem %s846_s13, 128  ;;  %s710_s18 = smov [#allocation5]  }
  0x30   : > { %p625_p11 = scmp.ne.s32.totalorder %s846_s13, %s624_s26  ;;  %s628_s29 = sshll.u32 %s710_s18, 4  ;;  %s629_s29 = int_to_ptr.vmem [resolvable:$false] %s628_s29 }
  0x31   : > { %s630_s30 = scalar_lea.vmem %s629_s29, 256  ;;  %p631_p0 = scmp.lt.s32.totalorder %s846_s13, %s629_s29 }
  0x32   : > { %p626_p12 = pnand %p625_p11, %p776_p4  ;;  %p632_p1 = scmp.lt.s32.totalorder %s630_s30, %s624_s26 }
  0x34   : > { %p627_p13 = pneg %p626_p12  ;;  %p633_p2 = por %p632_p1, %p631_p0 }
  0x36   : > { %p634_p3 = pnand %p633_p2, %p627_p13 }
  0xa8   : > { %v264_v12 = vpop.permute.xlu1 %263  ;;  %v257_v13 = vpop.permute.xlu0 %256 }
  0xa9   : > { %v259_v14 = vmul.f32 %v257_v13, %v247_v10  ;;  %v260_v15 = vmul.f32 %v257_v13, %v251_v11 }
  0xab   : > { %v266_v16 = vadd.f32 %v264_v12, %v259_v14  ;;  %v267_v17 = vadd.f32 %v264_v12, %v260_v15 }
  0xac   : > { %v316_v18 = vpop.permute.xlu0 %315  ;;  %v323_v25 = vpop.permute.xlu1 %322 }
  0xad   : > { %v269_v19 = vsel %vm268_vm0, %v266_v16, -inf  ;;  %v276_v20 = vsel %vm268_vm0, %v267_v17, -inf  ;;  %v318_v21 = vmul.f32 %v316_v18, %v247_v10  ;;  %v319_v22 = vmul.f32 %v316_v18, %v251_v11 }
  0xae   : > { %v270_v23 = vrot.slane %v269_v19, 4  ;;  %v277_v24 = vrot.slane %v276_v20, 4 }
  0xaf   : > { %v325_v26 = vadd.f32 %v323_v25, %v318_v21  ;;  %v326_v27 = vadd.f32 %v323_v25, %v319_v22 }
  0xb0   : > { %v271_v28 = vmax.f32 %v269_v19, %v270_v23  ;;  %v278_v29 = vmax.f32 %v276_v20, %v277_v24 }
  0xb1   : > { %v327_v30 = vsel %vm268_vm0, %v325_v26, -inf  ;;  %v334_v31 = vsel %vm268_vm0, %v326_v27, -inf }
  0xb2   : > { %v272_v32 = vrot.slane %v271_v28, 2  ;;  %v279_v33 = vrot.slane %v278_v29, 2  ;;  %v328_v34 = vrot.slane %v327_v30, 4  ;;  %v335_v35 = vrot.slane %v334_v31, 4 }
  0xb4   : > { %v273_v36 = vmax.f32 %v271_v28, %v272_v32  ;;  %v280_v37 = vmax.f32 %v278_v29, %v279_v33  ;;  %v329_v38 = vmax.f32 %v327_v30, %v328_v34  ;;  %v336_v39 = vmax.f32 %v334_v31, %v335_v35 }
  0xb5   : > { %v308_v32 = vstv %s305_s7  ;;  %v366_v34 = vstv %s509_s8 }
  0xb6   : > { %v274_v40 = vrot.slane %v273_v36, 1  ;;  %v281_v41 = vrot.slane %v280_v37, 1  ;;  %v330_v42 = vrot.slane %v329_v38, 2  ;;  %v337_v43 = vrot.slane %v336_v39, 2 }
  0xb8   : > { %v275_v44 = vmax.f32 %v273_v36, %v274_v40  ;;  %v282_v45 = vmax.f32 %v280_v37, %v281_v41  ;;  %v331_v46 = vmax.f32 %v329_v38, %v330_v42  ;;  %v338_v47 = vmax.f32 %v336_v39, %v337_v43 }
  0xba   : > { %v283_v48 = vsub.f32 %v266_v16, %v275_v44  ;;  %v284_v49 = vsub.f32 %v267_v17, %v282_v45  ;;  %v332_v50 = vrot.slane %v331_v46, 1  ;;  %v339_v51 = vrot.slane %v338_v47, 1 }
  0xbc   : > { %v285_v52 = vmul.f32 1.442695, %v283_v48  ;;  %v287_v53 = vmul.f32 1.442695, %v284_v49  ;;  %v333_v54 = vmax.f32 %v331_v46, %v332_v50  ;;  %v340_v55 = vmax.f32 %v338_v47, %v339_v51 }
  0xbe   : > { %585 = vpow2.f32 %v285_v52  ;;  %v341_v56 = vsub.f32 %v325_v26, %v333_v54  ;;  %v342_v57 = vsub.f32 %v326_v27, %v340_v55 }
  0xbf   : > { %587 = vpow2.f32 %v287_v53 }
  0xc0   : > { %v343_v58 = vmul.f32 1.442695, %v341_v56  ;;  %v345_v59 = vmul.f32 1.442695, %v342_v57 }
  0xc2   : > { %589 = vpow2.f32 %v343_v58 }
  0xc3   : > { %591 = vpow2.f32 %v345_v59 }
  0xc8   : > { %v586_v60 = vpop.eup %585 }
  0xc9   : > { %v588_v61 = vpop.eup %587  ;;  %v289_v62 = vsel %vm268_vm0, %v586_v60, 0.0 }
  0xca   : > { %v290_v63 = vrot.slane %v289_v62, 4  ;;  %v296_v0 = vsel %vm268_vm0, %v588_v61, 0.0 }
  0xcb   : > { %v297_v1 = vrot.slane %v296_v0, 4 }
  0xcc   : > { %v590_v2 = vpop.eup %589  ;;  %v291_v3 = vadd.f32 %v290_v63, %v289_v62 }
  0xcd   : > { %v592_v4 = vpop.eup %591  ;;  %v298_v5 = vadd.f32 %v297_v1, %v296_v0  ;;  %v347_v6 = vsel %vm268_vm0, %v590_v2, 0.0 }
  0xce   : > { %v292_v7 = vrot.slane %v291_v3, 2  ;;  %v348_v8 = vrot.slane %v347_v6, 4  ;;  %v354_v9 = vsel %vm268_vm0, %v592_v4, 0.0 }
  0xcf   : > { %v299_v10 = vrot.slane %v298_v5, 2  ;;  %v355_v11 = vrot.slane %v354_v9, 4 }
  0xd0   : > { %v293_v12 = vadd.f32 %v292_v7, %v291_v3  ;;  %v349_v13 = vadd.f32 %v348_v8, %v347_v6 }
  0xd1   : > { %v300_v14 = vadd.f32 %v299_v10, %v298_v5  ;;  %v356_v15 = vadd.f32 %v355_v11, %v354_v9 }
  0xd2   : > { %v294_v16 = vrot.slane %v293_v12, 1  ;;  %v350_v17 = vrot.slane %v349_v13, 2 }
  0xd3   : > { %v301_v18 = vrot.slane %v300_v14, 1  ;;  %v357_v19 = vrot.slane %v356_v15, 2 }
  0xd4   : > { %v295_v20 = vadd.f32 %v294_v16, %v293_v12  ;;  %v351_v21 = vadd.f32 %v350_v17, %v349_v13 }
  0xd5   : > { %v302_v22 = vadd.f32 %v301_v18, %v300_v14  ;;  %v358_v23 = vadd.f32 %v357_v19, %v356_v15 }
  0xd6   : > { %593 = vrcp.f32 %v295_v20  ;;  %v352_v24 = vrot.slane %v351_v21, 1 }
  0xd7   : > { %595 = vrcp.f32 %v302_v22  ;;  %v359_v25 = vrot.slane %v358_v23, 1 }
  0xd8   : > { %v353_v26 = vadd.f32 %v352_v24, %v351_v21 }
  0xd9   : > { %v360_v27 = vadd.f32 %v359_v25, %v358_v23 }
  0xda   : > { %597 = vrcp.f32 %v353_v26 }
  0xdb   : > { %599 = vrcp.f32 %v360_v27 }
  0xe0   : > { %v594_v28 = vpop.eup %593 }
  0xe1   : > { %v596_v29 = vpop.eup %595  ;;  %v306_v30 = vmul.f32 %v594_v28, %v586_v60 }
  0xe2   : > { %v307_v33 = vmul.f32 %v596_v29, %v588_v61 }
  0xe3   : > { %v309_v38 = vmul.f32 %v308_v32, %v306_v30 }
  0xe4   : > { %v598_v31 = vpop.eup %597  ;;  %v310_v40 = vmul.f32 %v308_v32, %v307_v33 }
  0xe5   : > { %v600_v35 = vpop.eup %599  ;;  %v364_v36 = vmul.f32 %v598_v31, %v590_v2 }
  0xe6   : > { %v365_v37 = vmul.f32 %v600_v35, %v592_v4 }
  0xe7   : > { %v367_v39 = vmul.f32 %v366_v34, %v364_v36 }
  0xe8   : > { %v368_v41 = vmul.f32 %v366_v34, %v365_v37 }
  0xe9   : > { %v369_v42 = vadd.f32 %v367_v39, %v309_v38 }
  0xea   : > { %v370_v43 = vadd.f32 %v368_v41, %v310_v40 }
  0xeb   : > { %v371_v44 = vmul.f32 1.442695, %v369_v42 }
  0xec   : > { %v373_v45 = vmul.f32 1.442695, %v370_v43 }
  0xed   : > { %601 = vpow2.f32 %v371_v44 }
  0xee   : > { %603 = vpow2.f32 %v373_v45 }
  0xf7   : > { %v602_v46 = vpop.eup %601 }
  0xf8   : > { %v604_v47 = vpop.eup %603  ;;  %v375_v48 = vsel %vm268_vm0, %v602_v46, 0.0 }
  0xf9   : > { %v376_v49 = vrot.slane %v375_v48, 4  ;;  %v382_v50 = vsel %vm268_vm0, %v604_v47, 0.0 }
  0xfa   : > { %v383_v51 = vrot.slane %v382_v50, 4 }
  0xfb   : > { %v377_v52 = vadd.f32 %v376_v49, %v375_v48 }
  0xfc   : > { %v384_v53 = vadd.f32 %v383_v51, %v382_v50 }
  0xfd   : > { %v378_v54 = vrot.slane %v377_v52, 2 }
  0xfe   : > { %v385_v55 = vrot.slane %v384_v53, 2 }
  0xff   : > { %v379_v56 = vadd.f32 %v378_v54, %v377_v52 }
 0x100   : > { %v386_v57 = vadd.f32 %v385_v55, %v384_v53 }
 0x101   : > { %v380_v58 = vrot.slane %v379_v56, 1 }
 0x102   : > { %v387_v59 = vrot.slane %v386_v57, 1 }
 0x103   : > { %v381_v60 = vadd.f32 %v380_v58, %v379_v56 }
 0x104   : > { %v388_v61 = vadd.f32 %v387_v59, %v386_v57 }
 0x105   : > { %605 = vrcp.f32 %v381_v60 }
 0x106   : > { %607 = vrcp.f32 %v388_v61 }
 0x10f   : > { %v606_v62 = vpop.eup %605 }
 0x110   : > { %v608_v63 = vpop.eup %607  ;;  %v391_v0 = vmul.f32 %v606_v62, %v602_v46 }
 0x111   : > { %v392_v1 = vmul.f32 %v608_v63, %v604_v47 }
 0x113   : > { %v395_v2 = vcombine.low %v391_v0, %v392_v1 }
 0x115   : > { %397 = vst [vmem:[%s227_s12] sm:$0xff] %v395_v2 }
 0x116   : > { %637 = shalt.err (!%p634_p3)
}
 0x117   : > { %s638_s5 = scalar_lea.hbm %s844_s22, 128  ;;  %s642_s8 = scalar_lea.hbm %s895_s4, 256 }
 0x118   : > { %p639_p5 = scmp.ne.s32.totalorder %s844_s22, %s638_s5  ;;  %p643_p9 = scmp.lt.u32.totalorder %s844_s22, %s895_s4 }
 0x119   : > { %p644_p10 = scmp.lt.u32.totalorder %s642_s8, %s638_s5  ;;  %p646_p12 = scmp.lt.u32.totalorder %s638_s5, %s844_s22 }
 0x11a   : > { %p640_p6 = pnand %p639_p5, %p776_p4 }
 0x11b   : > { %p645_p11 = por %p644_p10, %p643_p9 }
 0x11c   : > { %p641_p7 = pneg %p640_p6 }
 0x11d   : > { %p647_p13 = por %p646_p12, %p645_p11 }
 0x11f   : > { %p648_p0 = pnand %p647_p13, %p641_p7 }
 0x121   : > { %651 = shalt.err (!%p648_p0)
}
 0x122   : > { %520 = dma.vmem_to_hbm [thread:$0]  (%p776_p4), %s846_s13, 128, %s844_s22, %s399_s24  }
 0x123 PF: > { %p532_p1 = scmp.ge.s32.totalorder %s706_s20, 2  ;;  %s427_s11 = sand.u32 1, %s686_s15  }
 0x124   : > { %s428_s12 = scalar_lea.sflag [#allocation3], %s427_s11 }
 0x125   : > { %p527_p2 = pnand %p532_p1, %p783_p8 }
 0x127   : > { %681 = dma.done.wait (!%p527_p2), %s428_s12, 128  }
 0x128   : > { %683 = vsyncadd (!%p527_p2), %s428_s12, 4294967168  ;;  %s18_s20 = sadd.s32 1, %s706_s20   ;;  %s900_s15 = smov %s690_s16 }
 0x129   : > { %p15_p3 = scmp.ge.s32.totalorder %s18_s20, 4   ;;  %s901_s16 = smov %s694_s17 }
 0x12a   : > { %s902_s17 = smov %s789_s28  ;;  %s903_s18 = smov %s702_s19 }
 0x12b   : > { %s904_s19 = smov %s906_s23  ;;  %17 = sbr.rel (!%p15_p3) target bundleno = 5 (0x5), region = 76 }
 0x132   :  { %433 = vsyncpa [#allocation3], 1 }
 0x133   :  { %435 = vsyncpa [#allocation3 + $0x1], 1 }
 0x134   :  { %436 = vsyncpa [#allocation4], 1 }
 0x135   :  { %438 = vsyncpa [#allocation4 + $0x1], 1 }

</bundles_post_ra>
